<compile_context>
chip_gen: v5e
topology: v5e:2x2
jax: 0.10.0
libtpu: 0.0.40
codegen_flags: <defaults>
</compile_context>

<pallas_src>
import functools

import jax
import jax.numpy as jnp
from jax.experimental import pallas as pl
from jax.experimental.pallas import tpu as pltpu


def _fm_kernel(x_ref, o_ref, *, F: int, D: int, reduce_sum: bool):
    """x_ref: (TB, F*D) flattened batch tile; o_ref: (1,1,TB) or (TB, D)."""
    TB = x_ref.shape[0]
    # Static lane-slice loop over fields; accumulate in f32.
    x0 = x_ref[:, 0:D].astype(jnp.float32)
    s = x0                      # (TB, D) running sum over fields
    sq = x0 * x0                # (TB, D) running sum of squares
    for f in range(1, F):
        xf = x_ref[:, f * D:(f + 1) * D].astype(jnp.float32)
        s = s + xf
        sq = sq + xf * xf
    out = 0.5 * (s * s - sq)    # (TB, D)
    if reduce_sum:
        # Lane-dense store: one contiguous (1,1,TB) slab per tile.
        row = jnp.sum(out, axis=1)                       # (TB,)
        o_ref[...] = row.reshape(1, 1, TB).astype(o_ref.dtype)
    else:
        o_ref[...] = out.astype(o_ref.dtype)


def _choose_batch_tile(B: int, row_vmem_bytes: int, target_bytes: int) -> int:
    """Rows per tile (~target bytes of input per grid step, dtype-aware)."""
    rows = max(1, target_bytes // row_vmem_bytes)
    # Guarantee >=2 tiles when there is enough work so the "parallel" batch
    # axis can split across v7x's two TensorCores (harmless on v5e/v6e).
    if B * row_vmem_bytes >= 2 * 1024 * 1024:
        rows = min(rows, pl.cdiv(B, 2))
    if rows >= B:
        return B                              # single tile = full array dims
    if rows >= 128:
        return (rows // 128) * 128            # lane/DMA friendly alignment
    return max(8, (rows // 8) * 8)            # sublane alignment floor


def base_factorization_machine(
    input_x,
    reduce_sum: bool = True,
    *,
    target_tile_bytes: int = 8 * 1024 * 1024,
):
    """FM second-order term. input_x: (B, F, D) -> (B, 1) or (B, D)."""
    B, F, D = input_x.shape
    fd = F * D
    itemsize = input_x.dtype.itemsize
    # Size tiles by the lane-padded VMEM row footprint (conservative).
    fd_pad = ((fd + 127) // 128) * 128
    TB = _choose_batch_tile(B, fd_pad * itemsize, target_tile_bytes)
    num_tiles = pl.cdiv(B, TB)

    # Free, contiguous reshape: lane-dense (B, F*D) input stream.
    x2 = input_x.reshape(B, fd)

    kernel = functools.partial(_fm_kernel, F=F, D=D, reduce_sum=reduce_sum)

    in_specs = [pl.BlockSpec((TB, fd), lambda i: (i, 0))]
    if reduce_sum:
        # Lane-dense per-tile output slab; reshaped to (B, 1) below.
        out_shape = jax.ShapeDtypeStruct((num_tiles, 1, TB), input_x.dtype)
        out_specs = pl.BlockSpec((1, 1, TB), lambda i: (i, 0, 0))
    else:
        out_shape = jax.ShapeDtypeStruct((B, D), input_x.dtype)
        out_specs = pl.BlockSpec((TB, D), lambda i: (i, 0))

    out = pl.pallas_call(
        kernel,
        out_shape=out_shape,
        grid=(num_tiles,),
        in_specs=in_specs,
        out_specs=out_specs,
        compiler_params=pltpu.CompilerParams(
            # Batch tiles are independent -> megacore can shard them.
            dimension_semantics=("parallel",),
            # Double-buffered ~8 MiB input + f32 temporaries; fits v7x's
            # 64 MiB physical VMEM and trivially fits v5e/v6e's 128 MiB.
            vmem_limit_bytes=48 * 1024 * 1024,
        ),
    )(x2)

    if reduce_sum:
        # Drop the (discard-only) boundary rows of the last tile.
        out = out.reshape(num_tiles * TB)[:B].reshape(B, 1)
    return out


def _reference_fm(input_x, reduce_sum: bool = True):
    x = input_x.astype(jnp.float32)
    square_of_sum = jnp.sum(x, axis=1) ** 2
    sum_of_square = jnp.sum(x ** 2, axis=1)
    output = square_of_sum - sum_of_square
    if reduce_sum:
        output = jnp.sum(output, axis=1, keepdims=True)
    return (0.5 * output).astype(input_x.dtype)


if __name__ == "__main__":
    key = jax.random.PRNGKey(0)

    # --- Small shapes consistent with the module: (batch, field_size, embed_dim)
    B, F, D = 2, 4, 32
    x = jax.random.normal(key, (B, F, D), dtype=jnp.float32)

    out_sum = jax.block_until_ready(base_factorization_machine(x, reduce_sum=True))
    ref_sum = _reference_fm(x, reduce_sum=True)
    assert out_sum.shape == (B, 1)
    assert jnp.allclose(out_sum, ref_sum, atol=1e-5, rtol=1e-5)

    out_vec = jax.block_until_ready(base_factorization_machine(x, reduce_sum=False))
    ref_vec = _reference_fm(x, reduce_sum=False)
    assert out_vec.shape == (B, D)
    assert jnp.allclose(out_vec, ref_vec, atol=1e-5, rtol=1e-5)

    # --- Multi-tile + ragged boundary path (no jnp.pad copy anymore).
    B2, F2, D2 = 300, 4, 32
    x2 = jax.random.normal(jax.random.PRNGKey(1), (B2, F2, D2), dtype=jnp.float32)
    small_tile = 128 * F2 * D2 * 4   # forces TB=128 -> 3 grid steps, ragged last tile
    out2 = jax.block_until_ready(
        base_factorization_machine(x2, reduce_sum=True, target_tile_bytes=small_tile)
    )
    ref2 = _reference_fm(x2, reduce_sum=True)
    assert out2.shape == (B2, 1)
    assert jnp.allclose(out2, ref2, atol=1e-4, rtol=1e-4)

    out2v = jax.block_until_ready(
        base_factorization_machine(x2, reduce_sum=False, target_tile_bytes=small_tile)
    )
    ref2v = _reference_fm(x2, reduce_sum=False)
    assert out2v.shape == (B2, D2)
    assert jnp.allclose(out2v, ref2v, atol=1e-4, rtol=1e-4)

    # --- bf16 input: narrow (dtype-aware) DMA, in-kernel f32 accumulation.
    x3 = x2.astype(jnp.bfloat16)
    out3 = jax.block_until_ready(
        base_factorization_machine(x3, reduce_sum=True, target_tile_bytes=small_tile)
    )
    ref3 = _reference_fm(x3, reduce_sum=True)
    assert out3.shape == (B2, 1)
    assert jnp.allclose(out3.astype(jnp.float32), ref3.astype(jnp.float32),
                        atol=2e-1, rtol=2e-2)

    # --- Default-target path with >= 2 MiB input: exercises the >=2-tile
    #     (megacore) cap and the ragged boundary under the default tile size.
    B4 = 4100
    x4 = jax.random.normal(jax.random.PRNGKey(2), (B4, F, D), dtype=jnp.float32)
    out4 = jax.block_until_ready(base_factorization_machine(x4, reduce_sum=True))
    ref4 = _reference_fm(x4, reduce_sum=True)
    assert out4.shape == (B4, 1)
    assert jnp.allclose(out4, ref4, atol=1e-4, rtol=1e-4)

    print("KERNEL_OK")
</pallas_src>

<mosaic_0001>
module attributes {stable_mosaic.version = 11 : i64} {
  func.func @_fm_kernel(%arg0: i32, %arg1: memref<2x128xf32, #tpu.memory_space<vmem>>, %arg2: memref<1x1x2xf32, #tpu.memory_space<vmem>>) attributes {dimension_semantics = [#tpu.dimension_semantics<parallel>], iteration_bounds = array<i64: 1>, scalar_prefetch = 0 : i64, scratch_operands = 0 : i64, tpu.core_type = #tpu.core_type<tc>, window_params = [{transform_indices = @transform_0, window_bounds = array<i64: 2, 128>}, {transform_indices = @transform_1, window_bounds = array<i64: 1, 1, 2>}]} {
    %c0 = arith.constant 0 : index
    %c0_0 = arith.constant 0 : index
    %0 = vector.load %arg1[%c0, %c0_0] : memref<2x128xf32, #tpu.memory_space<vmem>>, vector<2x32xf32>
    %1 = arith.mulf %0, %0 : vector<2x32xf32>
    %c0_1 = arith.constant 0 : index
    %c32 = arith.constant 32 : index
    %2 = vector.load %arg1[%c0_1, %c32] : memref<2x128xf32, #tpu.memory_space<vmem>>, vector<2x32xf32>
    %3 = arith.addf %0, %2 : vector<2x32xf32>
    %4 = arith.mulf %2, %2 : vector<2x32xf32>
    %5 = arith.addf %1, %4 : vector<2x32xf32>
    %c0_2 = arith.constant 0 : index
    %c64 = arith.constant 64 : index
    %6 = vector.load %arg1[%c0_2, %c64] : memref<2x128xf32, #tpu.memory_space<vmem>>, vector<2x32xf32>
    %7 = arith.addf %3, %6 : vector<2x32xf32>
    %8 = arith.mulf %6, %6 : vector<2x32xf32>
    %9 = arith.addf %5, %8 : vector<2x32xf32>
    %c0_3 = arith.constant 0 : index
    %c96 = arith.constant 96 : index
    %10 = vector.load %arg1[%c0_3, %c96] : memref<2x128xf32, #tpu.memory_space<vmem>>, vector<2x32xf32>
    %11 = arith.addf %7, %10 : vector<2x32xf32>
    %12 = arith.mulf %10, %10 : vector<2x32xf32>
    %13 = arith.addf %9, %12 : vector<2x32xf32>
    %14 = arith.mulf %11, %11 : vector<2x32xf32>
    %15 = arith.subf %14, %13 : vector<2x32xf32>
    %cst = arith.constant 5.000000e-01 : f32
    %16 = vector.broadcast %cst : f32 to vector<2x32xf32>
    %17 = arith.mulf %16, %15 : vector<2x32xf32>
    %cst_4 = arith.constant dense<0.000000e+00> : vector<2xf32>
    %18 = vector.multi_reduction <add>, %17, %cst_4 [1] : vector<2x32xf32> to vector<2xf32>
    %19 = vector.shape_cast %18 : vector<2xf32> to vector<1x1x2xf32>
    %c0_5 = arith.constant 0 : index
    %c0_6 = arith.constant 0 : index
    %c0_7 = arith.constant 0 : index
    %20 = vector.load %arg2[%c0_5, %c0_6, %c0_7] : memref<1x1x2xf32, #tpu.memory_space<vmem>>, vector<1x1x2xf32>
    tpu.vector_store %arg2[%c0_5, %c0_6, %c0_7], %19 {strides = array<i32>} : memref<1x1x2xf32, #tpu.memory_space<vmem>>, vector<1x1x2xf32>,
    return
  }
  func.func @transform_0(%arg0: i32) -> (i32, i32) {
    %c0_i32 = arith.constant 0 : i32
    %c0_i32_0 = arith.constant 0 : i32
    return %arg0, %c0_i32 : i32, i32
  }
  func.func @transform_1(%arg0: i32) -> (i32, i32, i32) {
    %c0_i32 = arith.constant 0 : i32
    %c0_i32_0 = arith.constant 0 : i32
    %c0_i32_1 = arith.constant 0 : i32
    return %arg0, %c0_i32, %c0_i32_0 : i32, i32, i32
  }
}

</mosaic_0001>

<bundles_post_ra>
// kernel: tpu_custom_call.1
= control target key start
LH: loop header
LB: loop body
LE: loop exit
PB: predicated region body
PF: predicated region fallthrough
CT: control target
= control target key end

     0   :  { %6 = vsyncpa [#allocation3], 0  ;;  %s160_s0 = inlined_call_operand.hbm [shape: f32[2,128], index: 0, kind: input, shape index: {}]   ;;  %s161_s1 = inlined_call_operand.hbm [shape: f32[1,1,2], index: 1, kind: output, shape index: {}]  }
   0x1   :  { %7 = vsyncpa [#allocation4], 0  ;;  %s13_s8 = sshll.u32 %s160_s0, 4  ;;  %s139_s9 = smov [#allocation2]   ;;  %s14_s8 = int_to_ptr.hbm [resolvable:$true] %s13_s8 }
   0x2   :  { %s15_s10 = sshll.u32 %s139_s9, 4  ;;  %s16_s10 = int_to_ptr.vmem [resolvable:$true] %s15_s10 }
   0x3   :  { %18 = dma.hbm_to_vmem [thread:$0]  %s14_s8, 32, %s16_s10, [#allocation3]  }
   0x4   :  { %135 = dma.done.wait [#allocation3], 32  }
   0x5   :  { %136 = vsyncadd [#allocation3], 4294967264  ;;  %v23_v0 = vld [vmem:[#allocation2] sm:$0x3]  ;;  %s140_s11 = smov 96   ;;  %s141_s12 = smov 64   ;;  %v59_v18 = vlaneseq }
   0x6   :  { %26 = vrot.lane.b32.xlu0 %v23_v0, %s140_s11  ;;  %35 = vrot.lane.b32.xlu1 %v23_v0, %s141_s12  ;;  %s142_s13 = smov 32   ;;  %v24_v1 = vmul.f32 %v23_v0, %v23_v0  ;;  %vm54_vm0 = vcmask 254976   ;;  %s143_s0 = smov [#allocation5]   ;;  %vm63_vm1 = vcmask 8192  }
   0x7   :  { %43 = vrot.lane.b32.xlu2 %v23_v0, %s142_s13  ;;  %v60_v19 = vand.u32 127, %v59_v18  ;;  %s70_s14 = sshll.u32 %s143_s0, 4  ;;  %s72_s17 = sshll.u32 %s161_s1, 4  ;;  %s71_s14 = int_to_ptr.vmem [resolvable:$true] %s70_s14  ;;  %s73_s17 = int_to_ptr.hbm [resolvable:$true] %s72_s17 }
   0xe   :  { %31 = vrot.lane.b32.xlu0 %v24_v1, %s140_s11  ;;  %39 = vrot.lane.b32.xlu1 %v24_v1, %s141_s12 }
   0xf   :  { %47 = vrot.lane.b32.xlu2 %v24_v1, %s142_s13 }
  0x61   :  { %v44_v2 = vpop.permute.xlu2 %43 }
  0x69   :  { %v48_v11 = vpop.permute.xlu2 %47 }
  0x78   :  { %v27_v3 = vpop.permute.xlu0 %26  ;;  %v36_v4 = vpop.permute.xlu1 %35 }
  0x79   :  { %v29_v5 = vadd.f32 %v27_v3, %v23_v0 }
  0x7b   :  { %v38_v6 = vadd.f32 %v36_v4, %v29_v5 }
  0x7d   :  { %v46_v9 = vadd.f32 %v44_v2, %v38_v6 }
  0x7f   :  { %v51_v13 = vmul.f32 %v46_v9, %v46_v9 }
  0x80   :  { %v32_v7 = vpop.permute.xlu0 %31  ;;  %v40_v8 = vpop.permute.xlu1 %39 }
  0x81   :  { %v34_v10 = vadd.f32 %v32_v7, %v24_v1 }
  0x83   :  { %v42_v12 = vadd.f32 %v40_v8, %v34_v10 }
  0x85   :  { %v50_v14 = vadd.f32 %v48_v11, %v42_v12 }
  0x87   :  { %v52_v15 = vsub.f32 %v51_v13, %v50_v14 }
  0x89   :  { %v53_v16 = vmul.f32 0.5, %v52_v15 }
  0x8b   :  { %v55_v17 = vsel %vm54_vm0, %v53_v16, 0.0 }
  0x8c   :  { %56 = vadd.xlane.f32.xlu0 %v55_v17 }
  0xff   :  { %v57_v20 = vpop.xlane.xlu0 %56 }
 0x100   :  { %v61_v21 = vperm.slane %v57_v20, %v60_v19 }
 0x102   :  { %64 = vst.msk [vmem:[#allocation5] sm:$0x1] %vm63_vm1, %v61_v21 }
 0x103   :  { %75 = dma.vmem_to_hbm [thread:$0]  %s71_s14, 16, %s73_s17, [#allocation4]  }
 0x104   :  { %137 = dma.done.wait [#allocation4], 16  }
 0x105   :  { %138 = vsyncadd [#allocation4], 4294967280 }
 0x106   :  { %80 = vsyncpa [#allocation3], 1 }
 0x107   :  { %81 = vsyncpa [#allocation4], 1 }

</bundles_post_ra>
